<compile_context>
chip_gen: v6e
topology: v6e:2x2x1
jax: 0.10.0
libtpu: 0.0.40
codegen_flags: <defaults>
</compile_context>

<pallas_src>
import jax
import jax.numpy as jnp
from jax import lax
from jax.experimental import pallas as pl
from jax.experimental.pallas import tpu as pltpu


def _pick_tile(n, target, align):
    """Largest divisor of n that is <= target and align-aligned; fallback: n."""
    for d in range(min(n, max(1, target)), 0, -1):
        if n % d == 0 and d % align == 0:
            return d
    return n  # full extent always satisfies the layout constraint


def _vmem_capacity_bytes():
    try:
        info = pltpu.get_tpu_info()
        cap = getattr(info, "vmem_capacity_bytes", None)
        if cap:
            return int(cap)
    except Exception:
        pass
    return 64 << 20  # conservative default: v7x per-TensorCore VMEM


def feedback_head_kernel(h_ref, m_ref, w_ref, b_ref, inv_ref, o_ref, acc_ref):
    """Fused masked-mean-pool (reduction over the S grid axis) + linear head.

    h_ref:   (TB, TS, H)  bf16/f32  last_hidden_state tile (streamed)
    m_ref:   (TB, 1, TS)  bf16/f32  attention-mask tile, S lane-dense
    w_ref:   (H, CP)      f32       padded linear weight (CP = ceil(C/128)*128)
    b_ref:   (1, CP)      f32       padded linear bias
    inv_ref: (TB, 1)      f32       1 / clamp(sum(mask), 1e-9), precomputed
    o_ref:   (TB, CP)     f32       padded logits (same block for every S step)
    acc_ref: (TB, H)      f32       VMEM scratch: masked-sum accumulator
    """
    s = pl.program_id(1)

    @pl.when(s == 0)
    def _init():
        acc_ref[...] = jnp.zeros_like(acc_ref)

    # Masked sum over this sequence tile on the MXU:
    #   (TB, 1, TS) x (TB, TS, H) -> (TB, 1, H), f32 accumulate.
    # bf16 mask * bf16 hidden products are exact (mask is 0/1), so this matches
    # the f32-upcast reference bit-for-bit up to accumulation order.
    acc_ref[...] += lax.dot_general(
        m_ref[...], h_ref[...],
        dimension_numbers=(((2,), (1,)), ((0,), (0,))),
        preferred_element_type=jnp.float32)[:, 0, :]

    @pl.when(s == pl.num_programs(1) - 1)
    def _epilogue():
        # Row scaling commutes with the head matmul:
        #   ((acc * inv) @ W) + b == (acc @ W) * inv + b
        # so we scale the small (TB, CP) tile instead of (TB, H).
        logits = jnp.dot(acc_ref[...], w_ref[...],
                         preferred_element_type=jnp.float32)
        o_ref[...] = (logits * inv_ref[...] + b_ref[...]).astype(o_ref.dtype)


def feedback_head(hidden, mask, w, b, *, tb_target=8, ts_target=None):
    """hidden: (B,S,H) bf16/f32, mask: (B,S), w: (H,C), b: (1,C) -> (B,C) f32."""
    B, S, H = hidden.shape
    Hw, C = w.shape
    assert Hw == H
    h_dt = hidden.dtype
    h_bytes = jnp.dtype(h_dt).itemsize

    vmem_cap = _vmem_capacity_bytes()
    if ts_target is None:
        # Bigger streamed tiles on 128 MiB parts (v5e/v6e), tighter on v7x (64 MiB).
        ts_target = 1024 if vmem_cap >= (100 << 20) else 512

    # Lane-dense padded class dimension (unmasked vector stores, full MXU N).
    CP = pl.cdiv(C, 128) * 128
    w_pad = jnp.zeros((H, CP), jnp.float32).at[:, :C].set(w.astype(jnp.float32))
    b_pad = jnp.zeros((1, CP), jnp.float32).at[:, :C].set(
        b.reshape(1, C).astype(jnp.float32))

    # Mask laid out (B, 1, S): S lane-dense, same dtype as hidden so it feeds
    # the MXU directly (no f32 upcast of the hidden tile, no lane broadcast).
    mask3 = mask.astype(h_dt).reshape(B, 1, S)

    # 1 / clamp(sum(mask), 1e-9): B scalars, precomputed once in the wrapper
    # (removes the per-step mask reduce and the mask-sum scratch).
    denom = jnp.maximum(mask.astype(jnp.float32).sum(axis=1, keepdims=True), 1e-9)
    inv_denom = 1.0 / denom                                    # (B, 1) f32

    # Tile selection.
    #  - ts: multiple of 128 (lane-dense mask; also covers bf16 16-row sublane
    #    packing of the hidden tile) or the full S.
    #  - tb: multiple of 8 or the full B; when B is large enough, keep >= 2
    #    batch blocks so the "parallel" axis shards across v7x's 2 TensorCores.
    tb_cap = tb_target
    if B >= 16:
        tb_cap = min(tb_target, B // 2)
    tb = _pick_tile(B, tb_cap, 8)
    ts = _pick_tile(S, ts_target, 128)
    grid = (B // tb, S // ts)

    # Honest VMEM budget (double-buffered pipelined buffers + resident scratch),
    # including sublane/lane padding of the small tiles.
    sub_h = max(1, 32 // h_bytes)                 # sublane packing of hidden dtype
    ts_pad = pl.cdiv(ts, sub_h) * sub_h
    hid_buf = tb * ts_pad * H * h_bytes
    msk_buf = tb * sub_h * ts * h_bytes           # middle dim 1 pads to sublane pack
    w_buf = H * CP * 4
    b_buf = 8 * CP * 4
    inv_buf = max(tb, 8) * 128 * 4                # (tb, 1) lane/sublane padded
    out_buf = max(tb, 8) * CP * 4
    scratch = max(tb, 8) * H * 4
    # NOTE: constant-index weight/bias blocks are left at the default buffer
    # count (their footprint is < 1 MiB for real DeBERTa H); the budget below
    # already charges them twice.
    vmem_needed = 2 * (hid_buf + msk_buf + w_buf + b_buf + inv_buf + out_buf) + scratch
    vmem_limit = int(min(max(vmem_needed + (16 << 20), 32 << 20),
                         vmem_cap - (8 << 20)))

    cost = pl.CostEstimate(
        flops=2 * B * S * H + 2 * B * H * CP,
        transcendentals=0,
        bytes_accessed=(B * S * H * h_bytes        # streamed hidden (dominant)
                        + B * S * h_bytes          # mask
                        + H * CP * 4 + CP * 4      # head weights
                        + B * 4 + B * CP * 4),     # inv_denom + logits
    )

    out_pad = pl.pallas_call(
        feedback_head_kernel,
        out_shape=jax.ShapeDtypeStruct((B, CP), jnp.float32),
        grid_spec=pltpu.PrefetchScalarGridSpec(
            num_scalar_prefetch=0,
            grid=grid,
            in_specs=[
                pl.BlockSpec((tb, ts, H), lambda bi, si: (bi, si, 0)),   # hidden
                pl.BlockSpec((tb, 1, ts), lambda bi, si: (bi, 0, si)),   # mask
                pl.BlockSpec((H, CP), lambda bi, si: (0, 0)),            # weight
                pl.BlockSpec((1, CP), lambda bi, si: (0, 0)),            # bias
                pl.BlockSpec((tb, 1), lambda bi, si: (bi, 0)),           # 1/denom
            ],
            # Same output block for every S step -> resident accumulator output.
            out_specs=pl.BlockSpec((tb, CP), lambda bi, si: (bi, 0)),
            scratch_shapes=[pltpu.VMEM((tb, H), jnp.float32)],
        ),
        compiler_params=pltpu.CompilerParams(
            dimension_semantics=("parallel", "arbitrary"),
            vmem_limit_bytes=vmem_limit,
        ),
        cost_estimate=cost,
    )(hidden, mask3, w_pad, b_pad, inv_denom)

    return out_pad[:, :C]


def feedback_model_forward(ids, mask, embed_table, w, b, *, tb_target=8, ts_target=None):
    """Full FeedBackModel.forward with a synthetic backbone."""
    # TODO(synk): the pretrained DeBERTa-v3 backbone (AutoModel) has no clean
    # Pallas equivalent; a deterministic embedding lookup stands in for it,
    # producing `last_hidden_state` in bf16 (the real backbone output dtype).
    # With a real backbone, its (B, S, H) activation is handed to the fused
    # head kernel directly.
    hidden = embed_table[ids].astype(jnp.bfloat16)
    # Dropout(p=0.5) is identity at inference.
    return feedback_head(hidden, mask, w, b, tb_target=tb_target, ts_target=ts_target)


if __name__ == "__main__":
    B, S, H, C, V = 2, 256, 64, 4, 128   # batch, seq, hidden, num_classes, vocab

    key = jax.random.PRNGKey(0)
    k_emb, k_w, k_b, k_ids = jax.random.split(key, 4)

    embed_table = jax.random.normal(k_emb, (V, H), jnp.float32) * 0.02
    w = jax.random.normal(k_w, (H, C), jnp.float32) * (1.0 / jnp.sqrt(H))
    b = jax.random.normal(k_b, (1, C), jnp.float32) * 0.01

    ids = jax.random.randint(k_ids, (B, S), 0, V, dtype=jnp.int32)
    lens = jnp.array([[S], [100]], dtype=jnp.int32)
    mask = (jnp.arange(S)[None, :] < lens).astype(jnp.int32)

    # ts_target=128 forces a 2-step sequence-reduction grid at this toy shape,
    # so the accumulate + pl.when epilogue path is actually exercised.
    out = feedback_model_forward(ids, mask, embed_table, w, b, ts_target=128)
    out = jax.block_until_ready(out)

    # Pure-JAX reference (same bf16 hidden, f32 accumulation).
    hidden_ref = embed_table[ids].astype(jnp.bfloat16).astype(jnp.float32)
    m_exp = mask.astype(jnp.float32)[..., None]
    mean_ref = (hidden_ref * m_exp).sum(1) / jnp.maximum(m_exp.sum(1), 1e-9)
    ref = mean_ref @ w + b

    assert out.shape == (B, C)
    err = jnp.max(jnp.abs(out - ref))
    assert jnp.allclose(out, ref, atol=5e-4, rtol=1e-3), f"max abs err = {err}"
    print("KERNEL_OK")
</pallas_src>

<mosaic_0001>
module attributes {stable_mosaic.version = 11 : i64} {
  func.func @feedback_head_kernel(%arg0: i32, %arg1: i32, %arg2: memref<2x128x64xbf16, #tpu.memory_space<vmem>>, %arg3: memref<2x1x128xbf16, #tpu.memory_space<vmem>>, %arg4: memref<64x128xf32, #tpu.memory_space<vmem>>, %arg5: memref<1x128xf32, #tpu.memory_space<vmem>>, %arg6: memref<2x1xf32, #tpu.memory_space<vmem>>, %arg7: memref<2x128xf32, #tpu.memory_space<vmem>>, %arg8: memref<2x64xf32, #tpu.memory_space<vmem>>) attributes {dimension_semantics = [#tpu.dimension_semantics<parallel>, #tpu.dimension_semantics<arbitrary>], iteration_bounds = array<i64: 1, 2>, scalar_prefetch = 0 : i64, scratch_operands = 1 : i64, tpu.core_type = #tpu.core_type<tc>, window_params = [{transform_indices = @transform_0, window_bounds = array<i64: 2, 128, 64>}, {transform_indices = @transform_1, window_bounds = array<i64: 2, 1, 128>}, {pipeline_mode = #tpu.pipeline_mode<synchronous>, transform_indices = @transform_2, window_bounds = array<i64: 64, 128>}, {pipeline_mode = #tpu.pipeline_mode<synchronous>, transform_indices = @transform_3, window_bounds = array<i64: 1, 128>}, {transform_indices = @transform_4, window_bounds = array<i64: 2, 1>}, {transform_indices = @transform_5, window_bounds = array<i64: 2, 128>}]} {
    %c0_i32 = arith.constant 0 : i32
    %0 = arith.cmpi eq, %arg1, %c0_i32 : i32
    %1 = arith.extui %0 : i1 to i32
    %c0_i32_0 = arith.constant 0 : i32
    %2 = arith.cmpi ne, %1, %c0_i32_0 : i32
    scf.if %2 {
      %cst_11 = arith.constant 0.000000e+00 : f32
      %13 = vector.broadcast %cst_11 : f32 to vector<2x64xf32>
      %c0_12 = arith.constant 0 : index
      %c0_13 = arith.constant 0 : index
      %14 = vector.load %arg8[%c0_12, %c0_13] : memref<2x64xf32, #tpu.memory_space<vmem>>, vector<2x64xf32>
      tpu.vector_store %arg8[%c0_12, %c0_13], %13 {strides = array<i32>} : memref<2x64xf32, #tpu.memory_space<vmem>>, vector<2x64xf32>,
    } else {
    }
    %c0 = arith.constant 0 : index
    %c0_1 = arith.constant 0 : index
    %3 = vector.load %arg8[%c0, %c0_1] : memref<2x64xf32, #tpu.memory_space<vmem>>, vector<2x64xf32>
    %c0_2 = arith.constant 0 : index
    %c0_3 = arith.constant 0 : index
    %c0_4 = arith.constant 0 : index
    %4 = vector.load %arg3[%c0_2, %c0_3, %c0_4] : memref<2x1x128xbf16, #tpu.memory_space<vmem>>, vector<2x1x128xbf16>
    %c0_5 = arith.constant 0 : index
    %c0_6 = arith.constant 0 : index
    %c0_7 = arith.constant 0 : index
    %5 = vector.load %arg2[%c0_5, %c0_6, %c0_7] : memref<2x128x64xbf16, #tpu.memory_space<vmem>>, vector<2x128x64xbf16>
    %cst = arith.constant dense<0.000000e+00> : vector<2x1x64xf32>
    %6 = tpu.matmul %4, %5, %cst {dimension_numbers = #tpu.dot_dimension_numbers<[2], [1], [1], [2], [0, 0, 0, 1, 1, 2], [0], [0]>} : vector<2x1x128xbf16>, vector<2x128x64xbf16>, vector<2x1x64xf32> -> vector<2x1x64xf32>
    %7 = vector.shape_cast %6 : vector<2x1x64xf32> to vector<2x64xf32>
    %8 = arith.addf %3, %7 : vector<2x64xf32>
    %c0_8 = arith.constant 0 : index
    %c0_9 = arith.constant 0 : index
    %9 = vector.load %arg8[%c0_8, %c0_9] : memref<2x64xf32, #tpu.memory_space<vmem>>, vector<2x64xf32>
    tpu.vector_store %arg8[%c0_8, %c0_9], %8 {strides = array<i32>} : memref<2x64xf32, #tpu.memory_space<vmem>>, vector<2x64xf32>,
    %c1_i32 = arith.constant 1 : i32
    %10 = arith.cmpi eq, %arg1, %c1_i32 : i32
    %11 = arith.extui %10 : i1 to i32
    %c0_i32_10 = arith.constant 0 : i32
    %12 = arith.cmpi ne, %11, %c0_i32_10 : i32
    scf.if %12 {
      %c0_11 = arith.constant 0 : index
      %c0_12 = arith.constant 0 : index
      %13 = vector.load %arg8[%c0_11, %c0_12] : memref<2x64xf32, #tpu.memory_space<vmem>>, vector<2x64xf32>
      %c0_13 = arith.constant 0 : index
      %c0_14 = arith.constant 0 : index
      %14 = vector.load %arg4[%c0_13, %c0_14] : memref<64x128xf32, #tpu.memory_space<vmem>>, vector<64x128xf32>
      %cst_15 = arith.constant dense<0.000000e+00> : vector<2x128xf32>
      %15 = tpu.matmul %13, %14, %cst_15 {dimension_numbers = #tpu.dot_dimension_numbers<[1], [0], [0], [1], [0, 0, 1, 1], [], []>} : vector<2x64xf32>, vector<64x128xf32>, vector<2x128xf32> -> vector<2x128xf32>
      %c0_16 = arith.constant 0 : index
      %c0_17 = arith.constant 0 : index
      %16 = vector.load %arg6[%c0_16, %c0_17] : memref<2x1xf32, #tpu.memory_space<vmem>>, vector<2x1xf32>
      %17 = vector.broadcast %16 : vector<2x1xf32> to vector<2x128xf32>
      %18 = arith.mulf %15, %17 : vector<2x128xf32>
      %c0_18 = arith.constant 0 : index
      %c0_19 = arith.constant 0 : index
      %19 = vector.load %arg5[%c0_18, %c0_19] : memref<1x128xf32, #tpu.memory_space<vmem>>, vector<1x128xf32>
      %20 = vector.broadcast %19 : vector<1x128xf32> to vector<2x128xf32>
      %21 = arith.addf %18, %20 : vector<2x128xf32>
      %c0_20 = arith.constant 0 : index
      %c0_21 = arith.constant 0 : index
      %22 = vector.load %arg7[%c0_20, %c0_21] : memref<2x128xf32, #tpu.memory_space<vmem>>, vector<2x128xf32>
      tpu.vector_store %arg7[%c0_20, %c0_21], %21 {strides = array<i32>} : memref<2x128xf32, #tpu.memory_space<vmem>>, vector<2x128xf32>,
    } else {
    }
    return
  }
  func.func @transform_0(%arg0: i32, %arg1: i32) -> (i32, i32, i32) {
    %c0_i32 = arith.constant 0 : i32
    %c0_i32_0 = arith.constant 0 : i32
    return %arg0, %arg1, %c0_i32 : i32, i32, i32
  }
  func.func @transform_1(%arg0: i32, %arg1: i32) -> (i32, i32, i32) {
    %c0_i32 = arith.constant 0 : i32
    %c0_i32_0 = arith.constant 0 : i32
    return %arg0, %c0_i32, %arg1 : i32, i32, i32
  }
  func.func @transform_2(%arg0: i32, %arg1: i32) -> (i32, i32) {
    %c0_i32 = arith.constant 0 : i32
    %c0_i32_0 = arith.constant 0 : i32
    %c0_i32_1 = arith.constant 0 : i32
    return %c0_i32, %c0_i32_0 : i32, i32
  }
  func.func @transform_3(%arg0: i32, %arg1: i32) -> (i32, i32) {
    %c0_i32 = arith.constant 0 : i32
    %c0_i32_0 = arith.constant 0 : i32
    %c0_i32_1 = arith.constant 0 : i32
    return %c0_i32, %c0_i32_0 : i32, i32
  }
  func.func @transform_4(%arg0: i32, %arg1: i32) -> (i32, i32) {
    %c0_i32 = arith.constant 0 : i32
    %c0_i32_0 = arith.constant 0 : i32
    return %arg0, %c0_i32 : i32, i32
  }
  func.func @transform_5(%arg0: i32, %arg1: i32) -> (i32, i32) {
    %c0_i32 = arith.constant 0 : i32
    %c0_i32_0 = arith.constant 0 : i32
    return %arg0, %c0_i32 : i32, i32
  }
}

</mosaic_0001>

<bundles_post_ra>
// kernel: tpu_custom_call.1
= control target key start
LH: loop header
LB: loop body
LE: loop exit
PB: predicated region body
PF: predicated region fallthrough
CT: control target
= control target key end

     0   :  { %10 = vsyncpa [#allocation6], 0  ;;  %s1213_s18 = smov 0   ;;  %s1215_s19 = smov 0   ;;  %s1380_s0 = inlined_call_operand.vmem [shape: bf16[2,256,64], index: 0, kind: input, shape index: {}]   ;;  %s1381_s1 = inlined_call_operand.vmem [shape: bf16[2,1,256], index: 1, kind: input, shape index: {}]   ;;  %s1382_s2 = inlined_call_operand.vmem [shape: f32[64,128], index: 2, kind: input, shape index: {}]   ;;  %s1383_s3 = inlined_call_operand.vmem [shape: f32[1,128], index: 3, kind: input, shape index: {}]   ;;  %s1384_s4 = inlined_call_operand.vmem [shape: f32[2,1], index: 4, kind: input, shape index: {}]   ;;  %s1385_s5 = inlined_call_operand.hbm [shape: f32[2,128], index: 5, kind: output, shape index: {}]  }
   0x1   :  { %s1217_s20 = smov 0   ;;  %s1219_s21 = smov 0  }
   0x2   :  { %s1221_s22 = smov 0  }
   0x3 LB: > { %s916_s23 = sadd.s32 4294967295, %s1174_s22   ;;  %s25_s24 = sadd.s32 1, %s1170_s21  ;;  %s1174_s22 = sphi %s1221_s22, %s16_s22   ;;  %s1170_s21 = sphi %s1219_s21, %s1391_s21   ;;  %s1166_s20 = sphi %s1217_s20, %s1390_s20   ;;  %s1162_s19 = sphi %s1215_s19, %s1389_s19   ;;  %s1158_s18 = sphi %s1213_s18, %s1388_s18  }
   0x4   : > { %p26_p0 = scmp.ge.s32.totalorder %s25_s24, 2  ;;  %p44_p1 = scmp.ne.s32.totalorder %s1162_s19, %s1158_s18 }
   0x5   : > { %p45_p2 = scmp.eq.s32.totalorder %s1174_s22, 0  ;;  %s37_s27 = sadd.s32 1, %s1162_s19 }
   0x6   : > { %s1393_s24 = smov (%p26_p0, %s25_s24), 0  ;;  %p919_p5 = scmp.ge.s32.totalorder %s1174_s22, 2 }
   0x7   : > { %p1245_p3 = por %p45_p2, %p44_p1  ;;  %s33_s26 = ssub.s32 %s1170_s21, %s1393_s24 }
   0x8   : > { %p35_p4 = scmp.eq.s32.totalorder %s33_s26, 0  ;;  %205 = sbr.rel (%p919_p5) target bundleno = 30 (0x1e), region = 28 }
   0xa   : > { %s1253_s28 = scalar_select %p35_p4, %s1162_s19, %s37_s27  }
   0xd   : > { %208 = sbr.rel (!%p1245_p3) target bundleno = 25 (0x19), region = 32  ;;  %s210_s29 = sand.u32 (%p1245_p3), 1, %s1162_s19  }
   0xe   : > { %s951_s30 = sshll.u32 (%p1245_p3), %s1170_s21, 6  ;;  %s920_s6 = sshll.u32 (%p1245_p3), %s210_s29, 7 }
   0xf   : > { %s1263_s9 = scalar_lea.vmem (%p1245_p3), %s1380_s0, %s951_s30  ;;  %s212_s10 = scalar_lea.vmem (%p1245_p3), [#allocation3], %s920_s6 }
  0x10   : > { %v235_v0 = vld [vmem:[%s1263_s9] sm:$0xff] (%p1245_p3)   ;;  %v239_v1 = vld [vmem:[%s1263_s9 + $0x8] sm:$0xff] (%p1245_p3)   ;;  %v243_v2 = vld [vmem:[%s1263_s9 + $0x10] sm:$0xff] (%p1245_p3)  }
  0x11   : > { %236 = vst [vmem:[%s212_s10] sm:$0xff] (%p1245_p3), %v235_v0   ;;  %240 = vst [vmem:[%s212_s10 + $0x8] sm:$0xff] (%p1245_p3), %v239_v1   ;;  %v247_v3 = vld [vmem:[%s1263_s9 + $0x18] sm:$0xff] (%p1245_p3)   ;;  %v251_v4 = vld [vmem:[%s1263_s9 + $0x20] sm:$0xff] (%p1245_p3)  }
  0x12   : > { %244 = vst [vmem:[%s212_s10 + $0x10] sm:$0xff] %v243_v2   ;;  %v255_v5 = vld [vmem:[%s1263_s9 + $0x28] sm:$0xff]   ;;  %248 = vst [vmem:[%s212_s10 + $0x18] sm:$0xff] %v247_v3   ;;  %v259_v6 = vld [vmem:[%s1263_s9 + $0x30] sm:$0xff]  }
  0x13   : > { %252 = vst [vmem:[%s212_s10 + $0x20] sm:$0xff] %v251_v4   ;;  %256 = vst [vmem:[%s212_s10 + $0x28] sm:$0xff] %v255_v5   ;;  %v263_v7 = vld [vmem:[%s1263_s9 + $0x38] sm:$0xff]   ;;  %v267_v8 = vld [vmem:[%s1263_s9 + $0x80] sm:$0xff]  }
  0x14   : > { %260 = vst [vmem:[%s212_s10 + $0x30] sm:$0xff] %v259_v6   ;;  %264 = vst [vmem:[%s212_s10 + $0x38] sm:$0xff] %v263_v7   ;;  %v271_v9 = vld [vmem:[%s1263_s9 + $0x88] sm:$0xff]   ;;  %v275_v10 = vld [vmem:[%s1263_s9 + $0x90] sm:$0xff]  }
  0x15   : > { %268 = vst [vmem:[%s212_s10 + $0x40] sm:$0xff] %v267_v8   ;;  %v279_v11 = vld [vmem:[%s1263_s9 + $0x98] sm:$0xff]   ;;  %272 = vst [vmem:[%s212_s10 + $0x48] sm:$0xff] %v271_v9   ;;  %v283_v12 = vld [vmem:[%s1263_s9 + $0xa0] sm:$0xff]  }
  0x16   : > { %276 = vst [vmem:[%s212_s10 + $0x50] sm:$0xff] %v275_v10   ;;  %280 = vst [vmem:[%s212_s10 + $0x58] sm:$0xff] %v279_v11   ;;  %v287_v13 = vld [vmem:[%s1263_s9 + $0xa8] sm:$0xff]   ;;  %v291_v14 = vld [vmem:[%s1263_s9 + $0xb0] sm:$0xff]  }
  0x17   : > { %284 = vst [vmem:[%s212_s10 + $0x60] sm:$0xff] %v283_v12   ;;  %288 = vst [vmem:[%s212_s10 + $0x68] sm:$0xff] %v287_v13   ;;  %v295_v15 = vld [vmem:[%s1263_s9 + $0xb8] sm:$0xff]  }
  0x18   : > { %292 = vst [vmem:[%s212_s10 + $0x70] sm:$0xff] %v291_v14   ;;  %296 = vst [vmem:[%s212_s10 + $0x78] sm:$0xff] %v295_v15  }
  0x19 PF: > { %386 = sbr.rel (!%p1245_p3) target bundleno = 30 (0x1e), region = 73  ;;  %s388_s11 = sand.u32 (%p1245_p3), 1, %s1162_s19  }
  0x1a   : > { %s394_s14 = scalar_lea.vmem (%p1245_p3), %s1381_s1, %s1170_s21  ;;  %s923_s15 = sshll.u32 (%p1245_p3), %s388_s11, 1 }
  0x1b   : > { %v411_v16 = vld [vmem:[%s394_s14] sm:$0x1] (%p1245_p3)  ;;  %v413_v17 = vld [vmem:[%s394_s14 + $0x2] sm:$0x1] (%p1245_p3)  ;;  %s390_s16 = scalar_lea.vmem (%p1245_p3), [#allocation4], %s923_s15 }
  0x1c   : > { %412 = vst [vmem:[%s390_s16] sm:$0x1] (%p1245_p3), %v411_v16  ;;  %414 = vst [vmem:[%s390_s16 + $0x1] sm:$0x1] (%p1245_p3), %v413_v17 }
  0x1e PF: > { %p924_p6 = scmp.ge.s32.totalorder %s1174_s22, 1  ;;  %p433_p7 = scmp.lt.s32.totalorder %s1174_s22, 3 }
  0x20   : > { %p434_p8 = pnand %p924_p6, %p433_p7 }
  0x21   : > { %s440_s17 = sand.u32 (!%p434_p8), 1, %s1158_s18   ;;  %p927_p9 = scmp.ne.s32.totalorder (!%p434_p8), %s1166_s20, 0 }
  0x22   : > { %437 = sbr.rel (%p434_p8) target bundleno = 509 (0x1fd), region = 107  ;;  %s925_s25 = sshll.u32 (!%p434_p8), %s440_s17, 7 }
  0x23   : > { %s1291_s26 = sshll.u32 (!%p434_p8), %s440_s17, 1  ;;  %s1293_s27 = scalar_lea.vmem (!%p434_p8), [#allocation3], %s925_s25 }
  0x24   : > { %s449_s29 = scalar_lea.vmem (!%p434_p8), [#allocation4], %s1291_s26 }
  0x27   : > { %488 = sbr.rel (%p927_p9) target bundleno = 46 (0x2e), region = 119 }
  0x2c   : > { %vm489_vm0 = vcmask 517120   ;;  %v1176_v18 = vmov 0.0  }
  0x2d   : > { %490 = vst.msk [vmem:[#allocation2] sm:$0x3] %vm489_vm0, %v1176_v18 }
  0x2e PF: > { %v1091_v19 = vld [vmem:[%s1293_s27 + $0x38] sm:$0xff]   ;;  %v1177_v20 = vmov 0.0   ;;  %v1093_v22 = vld [vmem:[%s1293_s27 + $0x30] sm:$0xff]   ;;  %vm1178_vm1 = vmmov 0   ;;  %v1095_v24 = vld [vmem:[%s1293_s27 + $0x28] sm:$0xff]   ;;  %vm705_vm2 = vcmask 1041409  }
  0x2f   : > { %979 = vmatprep.subr.bf16.mxu0 %v1177_v20  ;;  %999 = vmatprep.subr.bf16.mxu1 %v1177_v20  ;;  %v1092_v21 = vld [vmem:[%s1293_s27 + $0x78] sm:$0xff]   ;;  %v1094_v23 = vld [vmem:[%s1293_s27 + $0x70] sm:$0xff]   ;;  %v1096_v25 = vld [vmem:[%s1293_s27 + $0x68] sm:$0xff]   ;;  %vm709_vm3 = vcmask 517120   ;;  %p944_p10 = scmp.ne.s32.totalorder %s1166_s20, 1 }
  0x30   : > { %980 = vmatpush3.bf16.msra.mxu0 %v1091_v19  ;;  %995 = vmatprep.mubr.msk.bf16.mxu0 %vm1178_vm1, %v1177_v20  ;;  %v1097_v26 = vld [vmem:[%s1293_s27 + $0x20] sm:$0xff]   ;;  %v1099_v28 = vld [vmem:[%s1293_s27 + $0x18] sm:$0xff]   ;;  %v1101_v30 = vld [vmem:[%s1293_s27 + $0x10] sm:$0xff]  }
  0x31   : > { %1000 = vmatpush3.bf16.msra.mxu1 %v1092_v21  ;;  %981 = vmatprep.subr.bf16.mxu0 %v1177_v20  ;;  %v1098_v27 = vld [vmem:[%s1293_s27 + $0x60] sm:$0xff]   ;;  %v1100_v29 = vld [vmem:[%s1293_s27 + $0x58] sm:$0xff]   ;;  %v1102_v31 = vld [vmem:[%s1293_s27 + $0x50] sm:$0xff]  }
  0x32   : > { %1001 = vmatprep.subr.bf16.mxu1 %v1177_v20  ;;  %1015 = vmatprep.mubr.msk.bf16.mxu1 %vm1178_vm1, %v1177_v20  ;;  %v1103_v32 = vld [vmem:[%s1293_s27 + $0x8] sm:$0xff]   ;;  %v1105_v34 = vld [vmem:[%s1293_s27] sm:$0xff]  }
  0x33   : > { %v1104_v33 = vld [vmem:[%s1293_s27 + $0x48] sm:$0xff]   ;;  %v1106_v35 = vld [vmem:[%s1293_s27 + $0x40] sm:$0xff]  }
  0x34   : > { %982 = vmatpush3.bf16.msra.mxu0 %v1093_v22  ;;  %v492_v36 = vld [vmem:[%s449_s29] sm:$0x1]  ;;  %v493_v37 = vld [vmem:[%s449_s29 + $0x1] sm:$0x1]  ;;  %v491_v40 = vld [vmem:[#allocation2] sm:$0x3] }
  0x35   : > { %1002 = vmatpush3.bf16.msra.mxu1 %v1094_v23  ;;  %983 = vmatprep.subr.bf16.mxu0 %v1177_v20 }
  0x36   : > { %1003 = vmatprep.subr.bf16.mxu1 %v1177_v20 }
  0x38   : > { %984 = vmatpush3.bf16.msra.mxu0 %v1095_v24 }
  0x39   : > { %1004 = vmatpush3.bf16.msra.mxu1 %v1096_v25  ;;  %985 = vmatprep.subr.bf16.mxu0 %v1177_v20 }
  0x3a   : > { %1005 = vmatprep.subr.bf16.mxu1 %v1177_v20 }
  0x3c   : > { %986 = vmatpush3.bf16.msra.mxu0 %v1097_v26 }
  0x3d   : > { %1006 = vmatpush3.bf16.msra.mxu1 %v1098_v27  ;;  %987 = vmatprep.subr.bf16.mxu0 %v1177_v20 }
  0x3e   : > { %1007 = vmatprep.subr.bf16.mxu1 %v1177_v20 }
  0x40   : > { %988 = vmatpush3.bf16.msra.mxu0 %v1099_v28 }
  0x41   : > { %1008 = vmatpush3.bf16.msra.mxu1 %v1100_v29  ;;  %989 = vmatprep.subr.bf16.mxu0 %v1177_v20 }
  0x42   : > { %1009 = vmatprep.subr.bf16.mxu1 %v1177_v20 }
  0x44   : > { %990 = vmatpush3.bf16.msra.mxu0 %v1101_v30 }
  0x45   : > { %1010 = vmatpush3.bf16.msra.mxu1 %v1102_v31  ;;  %991 = vmatprep.subr.bf16.mxu0 %v1177_v20 }
  0x46   : > { %1011 = vmatprep.subr.bf16.mxu1 %v1177_v20 }
  0x48   : > { %992 = vmatpush3.bf16.msra.mxu0 %v1103_v32 }
  0x49   : > { %1012 = vmatpush3.bf16.msra.mxu1 %v1104_v33  ;;  %993 = vmatprep.subr.bf16.mxu0 %v1177_v20 }
  0x4a   : > { %1013 = vmatprep.subr.bf16.mxu1 %v1177_v20 }
  0x4c   : > { %994 = vmatpush3.bf16.msra.mxu0 %v1105_v34 }
  0x4d   : > { %1014 = vmatpush3.bf16.msra.mxu1 %v1106_v35 }
  0x4f   : > { %996 = vmatmul.mubr.bf16.vlgmr.msra.gmra.mxu0 %v492_v36 }
  0x50   : > { %1016 = vmatmul.mubr.bf16.vlgmr.msra.gmra.mxu1 %v493_v37 }
 0x10f   : > { %v608_v38 = vpop.f32.mrf.mxu0 }
 0x110   : > { %v696_v39 = vpop.f32.mrf.mxu1 }
 0x111   : > { %v704_v41 = vrot.slane %v696_v39, 7  ;;  %v997_v42 = vpop.f32.mrf.mxu0 }
 0x112   : > { %v1017_v43 = vpop.f32.mrf.mxu1  ;;  %714 = sbr.rel (%p944_p10) target bundleno = 494 (0x1ee), region = 123 }
 0x113   : > { %v706_v44 = vsel %vm705_vm2, %v704_v41, %v608_v38  ;;  %v611_v45 = vpop.f32.mrf.mxu0 }
 0x114   : > { %v708_v46 = vadd.f32 %v706_v44, %v491_v40  ;;  %v699_v47 = vpop.f32.mrf.mxu1 }
 0x115   : > { %v998_v48 = vpop.f32.mrf.mxu0 }
 0x116   : > { %710 = vst.msk [vmem:[#allocation2] sm:$0x3] %vm709_vm3, %v708_v46  ;;  %v1018_v49 = vpop.f32.mrf.mxu1 }
 0x117   : > { %v723_v50 = vld [vmem:[%s1382_s2 + $0x38] sm:$0xff]  ;;  %v1179_v51 = vmov 0.0   ;;  %v722_v52 = vld [vmem:[%s1382_s2 + $0x30] sm:$0xff]  ;;  %vm1180_vm4 = vmmov 0   ;;  %v1181_v53 = vmov 0   ;;  %v721_v54 = vld [vmem:[%s1382_s2 + $0x28] sm:$0xff] }
 0x118   : > { %1019 = vmatprep.subr.mxu0 %v1179_v51  ;;  %1035 = vmatprep.mubr.msk.f32.mxu0 %vm1180_vm4, %v1179_v51  ;;  %v798_v55 = vld [vmem:[%s1384_s4] sm:$0x3]  ;;  %v719_v57 = vld [vmem:[%s1382_s2 + $0x18] sm:$0xff]  ;;  %v718_v58 = vld [vmem:[%s1382_s2 + $0x10] sm:$0xff]  ;;  %vm724_vm5 = vcmask 523264  }
 0x119   : > { %1020 = vmatpush3.msra.mxu0 %v723_v50  ;;  %1107 = vset.pattern.permute.xlu0 %v1181_v53  ;;  %v720_v56 = vld [vmem:[%s1382_s2 + $0x20] sm:$0xff]  ;;  %v717_v59 = vld [vmem:[%s1382_s2 + $0x8] sm:$0xff] }
 0x11a   : > { %1021 = vmatprep.subr.mxu0 %v1179_v51  ;;  %801 = vperm.xlu0 %1107, %v798_v55   ;;  %v716_v60 = vld [vmem:[%s1382_s2] sm:$0xff] }
 0x11b   : > { %1022 = vmatpush3.msra.mxu0 %v722_v52  ;;  %v946_v0 = vld [vmem:[%s1383_s3] ss:$0 sm:$0xff] }
 0x11c   : > { %1023 = vmatprep.subr.mxu0 %v1179_v51 }
 0x11d   : > { %1024 = vmatpush3.msra.mxu0 %v721_v54  ;;  %v715_v61 = vld [vmem:[#allocation2] sm:$0x3] }
 0x11e   : > { %1025 = vmatprep.subr.mxu0 %v1179_v51 }
 0x11f   : > { %1026 = vmatpush3.msra.mxu0 %v720_v56 }
 0x120   : > { %1027 = vmatprep.subr.mxu0 %v1179_v51 }
 0x121   : > { %1028 = vmatpush3.msra.mxu0 %v719_v57 }
 0x122   : > { %1029 = vmatprep.subr.mxu0 %v1179_v51 }
 0x123   : > { %1030 = vmatpush3.msra.mxu0 %v718_v58 }
 0x124   : > { %1031 = vmatprep.subr.mxu0 %v1179_v51 }
 0x125   : > { %1032 = vmatpush3.msra.mxu0 %v717_v59 }
 0x126   : > { %1033 = vmatprep.subr.mxu0 %v1179_v51 }
 0x127   : > { %1034 = vmatpush3.msra.mxu0 %v716_v60 }
 0x128   : > { %1036 = vmatmul.mubr.msk.f32.vlgmr.msra.gmra.mxu0 %vm724_vm5, %v715_v61 }
 0x195   : > { %v802_v62 = vpop.permute.xlu0 %801 }
 0x1e8   : > { %v794_v63 = vpop.f32.mrf.mxu0 }
 0x1e9   : > { %v804_v1 = vmul.f32 %v802_v62, %v794_v63 }
 0x1ea   : > { %v1037_v2 = vpop.f32.mrf.mxu0 }
 0x1eb   : > { %v812_v3 = vadd.f32 %v946_v0, %v804_v1 }
 0x1ed   : > { %813 = vst [vmem:[#allocation5] sm:$0x3] %v812_v3 }
 0x1ee PF: > { %p1350_p11 = scmp.eq.s32.totalorder %s916_s23, 1  ;;  %s1182_s6 = smov [#allocation5]  }
 0x1ef   : > { %s823_s7 = sshll.u32 %s1182_s6, 4  ;;  %s824_s7 = int_to_ptr.vmem [resolvable:$true] %s823_s7 }
 0x1f0   : > { %s1108_s8 = scalar_lea.vmem %s824_s7, 32  ;;  %p1115_p1 = scmp.lt.s32.totalorder %s824_s7, %s824_s7 }
 0x1f1   : > { %p1109_p12 = scmp.ne.s32.totalorder %s824_s7, %s1108_s8  ;;  %p1116_p2 = scmp.lt.s32.totalorder %s1108_s8, %s1108_s8 }
 0x1f3   : > { %p1110_p13 = pnand %p1109_p12, %p1350_p11  ;;  %p1117_p3 = por %p1116_p2, %p1115_p1 }
 0x1f5   : > { %p1111_p0 = pneg %p1110_p13 }
 0x1f7   : > { %p1118_p4 = pnand %p1117_p3, %p1111_p0 }
 0x1f9   : > { %1121 = shalt.err (!%p1118_p4)
}
 0x1fa   : > { %1039 = dma.vmem_to_hbm [thread:$0]  (%p1350_p11), %s824_s7, 32, %s1385_s5, [#allocation6]  }
 0x1fb   : > { %1153 = dma.done.wait (%p1350_p11), [#allocation6], 32  }
 0x1fc   : > { %1155 = vsyncadd (%p1350_p11), [#allocation6], 4294967264 }
 0x1fd PF: > { %s16_s22 = sadd.s32 1, %s1174_s22   ;;  %s1388_s18 = smov %s1162_s19 }
 0x1fe   : > { %p13_p5 = scmp.ge.s32.totalorder %s16_s22, 4   ;;  %s1389_s19 = smov %s1253_s28 }
 0x1ff   : > { %s1390_s20 = smov %s1170_s21  ;;  %s1391_s21 = smov %s1393_s24 }
 0x200   :  { %15 = sbr.rel (!%p13_p5) target bundleno = 3 (0x3), region = 167 }
 0x205   :  { %836 = vsyncpa [#allocation6], 1 }
 0x206   :  { %838 = vsyncpa [#allocation6 + $0x1], 1 }

</bundles_post_ra>
